<compile_context>
chip_gen: v6e
topology: v6e:2x2x1
jax: 0.10.0
libtpu: 0.0.40
codegen_flags: <defaults>
</compile_context>

<pallas_src>
import math

import jax
import jax.numpy as jnp
from jax.experimental import pallas as pl
from jax.experimental.pallas import tpu as pltpu


def _add_kernel(x_ref, pe_ref, o_ref):
    # In-kernel dtype promotion: casts are free VPU work hidden under DMA
    # (no-ops when dtypes already match).
    o_ref[...] = x_ref[...].astype(o_ref.dtype) + pe_ref[...].astype(o_ref.dtype)


def _default_tile_config():
    """Per-generation (tile_bytes, vmem_limit_bytes)."""
    try:
        kind = jax.devices()[0].device_kind.lower()
    except Exception:  # no devices / unexpected backend -> conservative default
        kind = ""
    if "v7" in kind:
        # 3.2 TB/s HBM: bigger tiles hide the ~0.35us/step overhead. Physical
        # VMEM is 64 MiB but the default scoped limit is 32 MiB -> set explicitly.
        return 4 * 1024 * 1024, 30 * 1024 * 1024
    if "v6" in kind or "trillium" in kind:
        return 3 * 1024 * 1024, 32 * 1024 * 1024
    if "v5 lite" in kind or "v5lite" in kind or "v5e" in kind:
        # 16 MiB default scoped VMEM: <=2 MiB tiles keep all buffers inside it.
        return 2 * 1024 * 1024, None
    return 2 * 1024 * 1024, None  # unknown / older generations: safe default


def _choose_tile_rows(R, B, C, itemsize, tile_bytes, sub):
    """Row-tile size: sublane-aligned, fits tile_bytes, >= ~8 grid steps, divides R."""
    if R <= sub:
        return R  # full-extent block (always legal)
    rows_budget = max(sub, tile_bytes // max(1, C * itemsize))
    tR = max(sub, min(R, (rows_budget // sub) * sub))
    # Enough grid steps that the DMA prologue/epilogue is hidden and both v7x
    # TensorCores get work (also restores pipelining on small-batch shapes).
    target_steps = 8
    while tR > sub and pl.cdiv(R, tR) * B < target_steps:
        tR = max(sub, (tR // 2 // sub) * sub)
    # Prefer a tile that divides R exactly (no masked partial trailing block),
    # but don't shrink below half the budgeted tile.
    for cand in range(tR, sub - 1, -sub):
        if cand * 2 < tR:
            break
        if R % cand == 0:
            return cand
    return tR


def _make_pe_spec(block_shape, index_map, single_buffer):
    # pe's block index only changes once every B grid steps -> double-buffering it
    # buys nothing; single-buffer to reclaim a full tile of VMEM.
    if single_buffer:
        try:
            return pl.BlockSpec(block_shape, index_map, pipeline_mode=pl.Buffered(1))
        except (TypeError, AttributeError):
            pass  # jax version without pipeline_mode -> plain (double-buffered) spec
    return pl.BlockSpec(block_shape, index_map)


def _broadcast_add(x3, pe2, *, tile_bytes, vmem_limit_bytes):
    """x3: (B, R, C); pe2: (R, C). Returns x3 + pe2[None] in the promoted dtype."""
    B, R, C = x3.shape
    out_dtype = jnp.promote_types(x3.dtype, pe2.dtype)
    out_item = jnp.dtype(out_dtype).itemsize
    min_item = min(jnp.dtype(x3.dtype).itemsize, jnp.dtype(pe2.dtype).itemsize, out_item)
    sub = max(8, 32 // min_item)  # packed sublanes: 8 f32, 16 bf16, 32 int8/fp8

    tR = _choose_tile_rows(R, B, C, out_item, tile_bytes, sub)
    num_r = pl.cdiv(R, tR)

    cp_kwargs = dict(dimension_semantics=("parallel", "parallel"))
    if vmem_limit_bytes is not None:
        cp_kwargs["vmem_limit_bytes"] = vmem_limit_bytes

    def run(single_buffer_pe):
        return pl.pallas_call(
            _add_kernel,
            out_shape=jax.ShapeDtypeStruct((B, R, C), out_dtype),
            grid=(num_r, B),  # row blocks outer, batch inner -> pe tile reused
            in_specs=[
                pl.BlockSpec((pl.Squeezed(), tR, C), lambda r, b: (b, r, 0)),
                _make_pe_spec((tR, C), lambda r, b: (r, 0), single_buffer_pe),
            ],
            out_specs=pl.BlockSpec((pl.Squeezed(), tR, C), lambda r, b: (b, r, 0)),
            compiler_params=pltpu.CompilerParams(**cp_kwargs),
        )(x3, pe2)

    try:
        return run(True)
    except Exception:
        # Only reachable if this jax/Mosaic rejects Buffered(1); a genuine tiling
        # bug would fail identically below and propagate.
        return run(False)


def learned_positional_encoding(x, pe, *, tile_bytes=None, vmem_limit_bytes=None,
                                min_kernel_bytes=1 << 20, force_kernel=False):
    """x: (B, S, D); pe: (max_length, D). Returns x + pe[:S] broadcast over B."""
    assert x.ndim == 3, "expected (batch, seq_len, d_model)"
    B, S, D = x.shape
    max_length, d_model = pe.shape
    assert d_model == D and S <= max_length

    out_dtype = jnp.promote_types(x.dtype, pe.dtype)  # match PyTorch promotion

    if tile_bytes is None:
        tile_bytes, auto_limit = _default_tile_config()
        if vmem_limit_bytes is None:
            vmem_limit_bytes = auto_limit

    total_bytes = B * S * D * jnp.dtype(out_dtype).itemsize
    if not force_kernel and total_bytes < min_kernel_bytes:
        # Launch + per-step overhead dwarfs a few-KiB add; XLA's fused add wins.
        return x.astype(out_dtype) + pe[None, :S, :].astype(out_dtype)

    pe_s = pe[:S]  # layout plumbing only; dtype casts happen inside the kernel

    if D % 128 == 0 and S % 8 == 0:
        # Natural layout: lane dim already 128-aligned, tile the sequence axis.
        return _broadcast_add(x, pe_s, tile_bytes=tile_bytes,
                              vmem_limit_bytes=vmem_limit_bytes)

    if (S * D) % 128 == 0:
        # Fold S into the lane dim so every store is a full-width unmasked vst.
        N = S * D
        L = N // 128
        g = 1
        for cand in range(min(L, 32), 0, -1):  # lane width C = 128*g <= 4096
            if L % cand == 0:
                g = cand
                break
        C = 128 * g
        R = N // C
        out = _broadcast_add(x.reshape(B, R, C), pe_s.reshape(R, C),
                             tile_bytes=tile_bytes, vmem_limit_bytes=vmem_limit_bytes)
        return out.reshape(B, S, D)

    # TODO(synk): shapes where S*D is not a multiple of 128 fall back to XLA's add.
    return x.astype(out_dtype) + pe[None, :S, :].astype(out_dtype)


def init_pe(key, max_length, d_model, dtype=jnp.float32):
    """Deterministic xavier_uniform_ with gain = calculate_gain('relu') = sqrt(2)."""
    gain = math.sqrt(2.0)
    fan_out, fan_in = max_length, d_model  # torch: fan_in=size(1), fan_out=size(0)
    bound = gain * math.sqrt(6.0 / (fan_in + fan_out))
    return jax.random.uniform(
        key, (max_length, d_model), dtype=dtype, minval=-bound, maxval=bound
    )


if __name__ == "__main__":
    key = jax.random.PRNGKey(0)
    k_pe1, k_pe2, k_pe3, k_pe4, k_x1, k_x2, k_x3, k_x4 = jax.random.split(key, 8)
    max_length = 5000

    # 1) Tiny spec shape (B=2, S=8, D=32): forces the flatten path (S*D = 256 lanes),
    #    plus checks the small-size XLA-fallback dispatch.
    B, S, D = 2, 8, 32
    pe1 = init_pe(k_pe1, max_length, D)
    x1 = jax.random.normal(k_x1, (B, S, D), dtype=jnp.float32)
    out1 = jax.block_until_ready(
        learned_positional_encoding(x1, pe1, force_kernel=True))
    ref1 = x1 + pe1[None, :S, :]
    assert out1.shape == ref1.shape and out1.dtype == ref1.dtype
    assert jnp.allclose(out1, ref1, atol=1e-6), "mismatch (flatten path, tiny)"
    out1b = jax.block_until_ready(learned_positional_encoding(x1, pe1))
    assert jnp.allclose(out1b, ref1, atol=1e-6), "mismatch (small-size fallback)"

    # 2) d_model multiple of 128: natural tiled path with multiple sequence blocks
    #    (small tile budget forces tiling of S=72).
    B2, S2, D2 = 2, 72, 128
    pe2 = init_pe(k_pe2, max_length, D2)
    x2 = jax.random.normal(k_x2, (B2, S2, D2), dtype=jnp.float32)
    out2 = jax.block_until_ready(
        learned_positional_encoding(x2, pe2, force_kernel=True,
                                    tile_bytes=16 * 1024))
    ref2 = x2 + pe2[None, :S2, :]
    assert jnp.allclose(out2, ref2, atol=1e-6), "mismatch (natural tiled path)"

    # 3) Mixed precision (bf16 activations + f32 pe): in-kernel promotion, f32 out.
    B3, S3, D3 = 2, 64, 128
    pe3 = init_pe(k_pe3, max_length, D3)
    x3 = jax.random.normal(k_x3, (B3, S3, D3), dtype=jnp.float32).astype(jnp.bfloat16)
    out3 = jax.block_until_ready(
        learned_positional_encoding(x3, pe3, force_kernel=True))
    ref3 = x3.astype(jnp.float32) + pe3[None, :S3, :]
    assert out3.dtype == jnp.float32, "promotion should yield f32"
    assert jnp.allclose(out3, ref3, atol=1e-6), "mismatch (mixed-precision path)"

    # 4) Small d_model at larger S: flatten path with multiple row blocks.
    B4, S4, D4 = 2, 1024, 64
    pe4 = init_pe(k_pe4, max_length, D4)
    x4 = jax.random.normal(k_x4, (B4, S4, D4), dtype=jnp.float32)
    out4 = jax.block_until_ready(
        learned_positional_encoding(x4, pe4, force_kernel=True,
                                    tile_bytes=32 * 1024))
    ref4 = x4 + pe4[None, :S4, :]
    assert jnp.allclose(out4, ref4, atol=1e-6), "mismatch (flatten tiled path)"

    print("KERNEL_OK")
</pallas_src>

<mosaic_0001>
module attributes {stable_mosaic.version = 11 : i64} {
  func.func @_add_kernel(%arg0: i32, %arg1: i32, %arg2: memref<1x1x256xf32, #tpu.memory_space<vmem>>, %arg3: memref<1x256xf32, #tpu.memory_space<vmem>>, %arg4: memref<1x1x256xf32, #tpu.memory_space<vmem>>) attributes {dimension_semantics = [#tpu.dimension_semantics<parallel>, #tpu.dimension_semantics<parallel>], iteration_bounds = array<i64: 1, 2>, scalar_prefetch = 0 : i64, scratch_operands = 0 : i64, tpu.core_type = #tpu.core_type<tc>, window_params = [{transform_indices = @transform_0, window_bounds = array<i64: 1, 1, 256>}, {pipeline_mode = #tpu.pipeline_mode<synchronous>, transform_indices = @transform_1, window_bounds = array<i64: 1, 256>}, {transform_indices = @transform_2, window_bounds = array<i64: 1, 1, 256>}]} {
    %c0 = arith.constant 0 : index
    %c0_0 = arith.constant 0 : index
    %c0_1 = arith.constant 0 : index
    %0 = vector.load %arg2[%c0, %c0_0, %c0_1] : memref<1x1x256xf32, #tpu.memory_space<vmem>>, vector<1x1x256xf32>
    %1 = vector.shape_cast %0 : vector<1x1x256xf32> to vector<1x256xf32>
    %c0_2 = arith.constant 0 : index
    %c0_3 = arith.constant 0 : index
    %2 = vector.load %arg3[%c0_2, %c0_3] : memref<1x256xf32, #tpu.memory_space<vmem>>, vector<1x256xf32>
    %3 = arith.addf %1, %2 : vector<1x256xf32>
    %c0_4 = arith.constant 0 : index
    %c0_5 = arith.constant 0 : index
    %c0_6 = arith.constant 0 : index
    %4 = vector.load %arg4[%c0_4, %c0_5, %c0_6] : memref<1x1x256xf32, #tpu.memory_space<vmem>>, vector<1x1x256xf32>
    %5 = vector.shape_cast %4 : vector<1x1x256xf32> to vector<1x256xf32>
    %6 = vector.shape_cast %3 : vector<1x256xf32> to vector<1x1x256xf32>
    tpu.vector_store %arg4[%c0_4, %c0_5, %c0_6], %6 {strides = array<i32>} : memref<1x1x256xf32, #tpu.memory_space<vmem>>, vector<1x1x256xf32>,
    return
  }
  func.func @transform_0(%arg0: i32, %arg1: i32) -> (i32, i32, i32) {
    %c0_i32 = arith.constant 0 : i32
    %c0_i32_0 = arith.constant 0 : i32
    return %arg1, %arg0, %c0_i32 : i32, i32, i32
  }
  func.func @transform_1(%arg0: i32, %arg1: i32) -> (i32, i32) {
    %c0_i32 = arith.constant 0 : i32
    %c0_i32_0 = arith.constant 0 : i32
    return %arg0, %c0_i32 : i32, i32
  }
  func.func @transform_2(%arg0: i32, %arg1: i32) -> (i32, i32, i32) {
    %c0_i32 = arith.constant 0 : i32
    %c0_i32_0 = arith.constant 0 : i32
    return %arg1, %arg0, %c0_i32 : i32, i32, i32
  }
}

module attributes {stable_mosaic.version = 11 : i64} {
  func.func @_add_kernel(%arg0: i32, %arg1: i32, %arg2: memref<1x1x256xf32, #tpu.memory_space<vmem>>, %arg3: memref<1x256xf32, #tpu.memory_space<vmem>>, %arg4: memref<1x1x256xf32, #tpu.memory_space<vmem>>) attributes {dimension_semantics = [#tpu.dimension_semantics<parallel>, #tpu.dimension_semantics<parallel>], iteration_bounds = array<i64: 1, 2>, scalar_prefetch = 0 : i64, scratch_operands = 0 : i64, tpu.core_type = #tpu.core_type<tc>, window_params = [{transform_indices = @transform_0, window_bounds = array<i64: 1, 1, 256>}, {transform_indices = @transform_1, window_bounds = array<i64: 1, 256>}, {transform_indices = @transform_2, window_bounds = array<i64: 1, 1, 256>}]} {
    %c0 = arith.constant 0 : index
    %c0_0 = arith.constant 0 : index
    %c0_1 = arith.constant 0 : index
    %0 = vector.load %arg2[%c0, %c0_0, %c0_1] : memref<1x1x256xf32, #tpu.memory_space<vmem>>, vector<1x1x256xf32>
    %1 = vector.shape_cast %0 : vector<1x1x256xf32> to vector<1x256xf32>
    %c0_2 = arith.constant 0 : index
    %c0_3 = arith.constant 0 : index
    %2 = vector.load %arg3[%c0_2, %c0_3] : memref<1x256xf32, #tpu.memory_space<vmem>>, vector<1x256xf32>
    %3 = arith.addf %1, %2 : vector<1x256xf32>
    %c0_4 = arith.constant 0 : index
    %c0_5 = arith.constant 0 : index
    %c0_6 = arith.constant 0 : index
    %4 = vector.load %arg4[%c0_4, %c0_5, %c0_6] : memref<1x1x256xf32, #tpu.memory_space<vmem>>, vector<1x1x256xf32>
    %5 = vector.shape_cast %4 : vector<1x1x256xf32> to vector<1x256xf32>
    %6 = vector.shape_cast %3 : vector<1x256xf32> to vector<1x1x256xf32>
    tpu.vector_store %arg4[%c0_4, %c0_5, %c0_6], %6 {strides = array<i32>} : memref<1x1x256xf32, #tpu.memory_space<vmem>>, vector<1x1x256xf32>,
    return
  }
  func.func @transform_0(%arg0: i32, %arg1: i32) -> (i32, i32, i32) {
    %c0_i32 = arith.constant 0 : i32
    %c0_i32_0 = arith.constant 0 : i32
    return %arg1, %arg0, %c0_i32 : i32, i32, i32
  }
  func.func @transform_1(%arg0: i32, %arg1: i32) -> (i32, i32) {
    %c0_i32 = arith.constant 0 : i32
    %c0_i32_0 = arith.constant 0 : i32
    return %arg0, %c0_i32 : i32, i32
  }
  func.func @transform_2(%arg0: i32, %arg1: i32) -> (i32, i32, i32) {
    %c0_i32 = arith.constant 0 : i32
    %c0_i32_0 = arith.constant 0 : i32
    return %arg1, %arg0, %c0_i32 : i32, i32, i32
  }
}

</mosaic_0001>

<bundles_post_ra>
// kernel: tpu_custom_call.1
= control target key start
LH: loop header
LB: loop body
LE: loop exit
PB: predicated region body
PF: predicated region fallthrough
CT: control target
= control target key end

     0   :  { %7 = vsyncpa [#allocation3], 0  ;;  %s731_s0 = inlined_call_operand.hbm [shape: f32[2,1,256], index: 0, kind: input, shape index: {}]   ;;  %s732_s1 = inlined_call_operand.hbm [shape: f32[1,256], index: 1, kind: input, shape index: {}]   ;;  %s733_s2 = inlined_call_operand.hbm [shape: f32[2,1,256], index: 2, kind: output, shape index: {}]  }
   0x1   :  { %9 = vsyncpa [#allocation3 + $0x1], 0 }
   0x2   :  { %10 = vsyncpa [#allocation6], 0 }
   0x3   :  { %11 = vsyncpa [#allocation4], 0 }
   0x4   :  { %13 = vsyncpa [#allocation4 + $0x1], 0  ;;  %s570_s9 = smov 0   ;;  %s572_s10 = smov 0  }
   0x5   :  { %s574_s11 = smov 0   ;;  %s576_s12 = smov 0  }
   0x6   :  { %s578_s13 = smov 0   ;;  %s580_s14 = smov 0  }
   0x7 LB: > { %s320_s15 = sadd.s32 4294967295, %s550_s14   ;;  %s321_s16 = sadd.s32 4294967294, %s550_s14   ;;  %s550_s14 = sphi %s580_s14, %s19_s14   ;;  %s546_s13 = sphi %s578_s13, %s750_s13   ;;  %s542_s12 = sphi %s576_s12, %s749_s12   ;;  %s538_s11 = sphi %s574_s11, %s748_s11   ;;  %s534_s10 = sphi %s572_s10, %s747_s10   ;;  %s530_s9 = sphi %s570_s9, %s746_s9  }
   0x8   : > { %p53_p0 = scmp.ne.s32.totalorder %s534_s10, %s530_s9  ;;  %p604_p1 = scmp.eq.s32.totalorder %s320_s15, 0 }
   0x9   : > { %p608_p2 = scmp.eq.s32.totalorder %s320_s15, 1  ;;  %p111_p3 = scmp.eq.s32.totalorder %s321_s16, 1 }
   0xa   : > { %p614_p4 = por %p604_p1, %p53_p0  ;;  %p322_p5 = scmp.ge.s32.totalorder %s550_s14, 1 }
   0xb   : > { %p619_p6 = por %p111_p3, %p53_p0  ;;  %p118_p7 = scmp.lt.s32.totalorder %s550_s14, 3 }
   0xc   : > { %s737_s19 = scalar_select %p614_p4, 1, 0 }
   0xd   : > { %s738_s20 = scalar_select %p619_p6, 1, 0 }
   0xe   : > { %p624_p8 = pnand %p322_p5, %p118_p7  ;;  %s552_s22 = smov [#allocation5]  }
   0xf   : > { %s134_s23 = sshll.u32 %s552_s22, 4  ;;  %s28_s25 = sadd.s32 1, %s546_s13  ;;  %s135_s23 = int_to_ptr.vmem [resolvable:$true] %s134_s23 }
  0x10   : > { %p347_p10 = pneg %p624_p8  ;;  %s40_s26 = sadd.s32 1, %s538_s11 }
  0x11   : > { %p29_p12 = scmp.ge.s32.totalorder %s28_s25, 2  ;;  %s423_s27 = scalar_lea.vmem %s135_s23, 32 }
  0x12   : > { %p633_p11 = pnand %p347_p10, %p604_p1  ;;  %p424_p0 = scmp.ne.s32.totalorder %s135_s23, %s423_s27 }
  0x13   : > { %p431_p7 = scmp.lt.s32.totalorder %s135_s23, %s135_s23  ;;  %p432_p6 = scmp.lt.s32.totalorder %s423_s27, %s423_s27 }
  0x14   : > { %p414_p13 = pneg %p633_p11 }
  0x15   : > { %p433_p9 = por %p432_p6, %p431_p7 }
  0x16   : > { %p426_p3 = pnand %p424_p0, %p414_p13 }
  0x18   : > { %p427_p5 = pneg %p426_p3 }
  0x1a   : > { %p434_p4 = pnand %p433_p9, %p427_p5 }
  0x1c   : > { %437 = shalt.err (!%p434_p4)
}
  0x1d   : > { %350 = dma.hbm_to_vmem [thread:$0]  (!%p633_p11), %s732_s1, 32, %s135_s23, [#allocation6]  }
  0x1e   : > { %s752_s25 = smov (%p29_p12, %s28_s25), 0  ;;  %p47_p6 = scmp.ne.s32.totalorder %s538_s11, %s534_s10 }
  0x1f   : > { %p48_p4 = scmp.eq.s32.totalorder %s550_s14, 0  ;;  %s35_s30 = ssub.s32 %s546_s13, %s752_s25 }
  0x20   : > { %p360_p9 = scmp.lt.s32.totalorder %s550_s14, 2  ;;  %p38_p10 = scmp.eq.s32.totalorder %s35_s30, 0 }
  0x21   : > { %p49_p13 = por %p48_p4, %p47_p6  ;;  %p656_p0 = por %p608_p2, %p47_p6 }
  0x22   : > { %s145_s4 = sand.u32 1, %s538_s11   ;;  %s337_s7 = sshll.u32 %s546_s13, 5 }
  0x23   : > { %s662_s5 = scalar_select %p38_p10, %s538_s11, %s40_s26  }
  0x24   : > { %s325_s6 = sshll.u32 %s145_s4, 1  ;;  %s157_s16 = scalar_lea.hbm %s731_s0, %s337_s7 }
  0x25   : > { %s149_s22 = scalar_lea.vmem [#allocation2], %s325_s6  ;;  %p668_p11 = pnand %p360_p9, %p49_p13 }
  0x26   : > { %s159_s23 = sshll.u32 %s149_s22, 4  ;;  %s146_s18 = scalar_lea.sflag [#allocation3], %s145_s4  ;;  %s160_s23 = int_to_ptr.vmem [resolvable:$true] %s159_s23 }
  0x27   : > { %p440_p2 = pneg %p668_p11  ;;  %s451_s27 = scalar_lea.vmem %s160_s23, 32 }
  0x28   : > { %p452_p12 = scmp.ne.s32.totalorder %s160_s23, %s451_s27  ;;  %s553_s26 = smov [#allocation2]  }
  0x29   : > { %s456_s28 = sshll.u32 %s553_s26, 4  ;;  %s457_s28 = int_to_ptr.vmem [resolvable:$false] %s456_s28 }
  0x2a   : > { %p454_p3 = pnand %p452_p12, %p440_p2  ;;  %s458_s29 = scalar_lea.vmem %s457_s28, 64 }
  0x2b   : > { %p459_p7 = scmp.lt.s32.totalorder %s160_s23, %s457_s28  ;;  %p460_p6 = scmp.lt.s32.totalorder %s458_s29, %s451_s27 }
  0x2c   : > { %p455_p5 = pneg %p454_p3 }
  0x2d   : > { %p461_p4 = por %p460_p6, %p459_p7 }
  0x2f   : > { %p462_p10 = pnand %p461_p4, %p455_p5 }
  0x31   : > { %465 = shalt.err (!%p462_p10)
}
  0x32   : > { %354 = dma.hbm_to_vmem [thread:$0]  (!%p668_p11), %s157_s16, 32, %s160_s23, %s146_s18  }
  0x33   : > { %168 = sbr.rel (%p624_p8) target bundleno = 83 (0x53), region = 28  ;;  %s679_s30 = sand.u32 (!%p624_p8), 1, %s534_s10  }
  0x34   : > { %s329_s4 = sshll.u32 (!%p624_p8), %s679_s30, 1  ;;  %s171_s6 = scalar_lea.sflag (!%p624_p8), [#allocation3], %s679_s30 }
  0x35   : > { %s174_s7 = scalar_lea.vmem (!%p624_p8), [#allocation2], %s329_s4  ;;  %p743_p9 = scmp.ne.s32.totalorder (!%p624_p8), %s737_s19, 0 }
  0x38   : > { %517 = dma.done.wait (%p743_p9), %s171_s6, 32  }
  0x39   : > { %519 = vsyncadd (%p743_p9), %s171_s6, 4294967264 }
  0x3a   : > { %521 = dma.done.wait (%p604_p1), [#allocation6], 32  }
  0x3b   : > { %523 = vsyncadd (%p604_p1), [#allocation6], 4294967264  ;;  %v202_v0 = vlaneseq  ;;  %s198_s21 = scalar_lea.vmem [#allocation7], %s329_s4  ;;  %s338_s15 = sshll.u32 %s542_s12, 5  ;;  %v199_v1 = vld [vmem:[%s174_s7] sm:$0x3] }
  0x3c   : > { %s224_s8 = sshll.u32 %s198_s21, 4  ;;  %v200_v2 = vld [vmem:[#allocation5] sm:$0x3]  ;;  %s222_s22 = scalar_lea.hbm %s733_s2, %s338_s15  ;;  %s225_s8 = int_to_ptr.vmem [resolvable:$true] %s224_s8 }
  0x3d   : > { %vm204_vm0 = vcmp.lt.s32.totalorder %v202_v0, 256  ;;  %v201_v3 = vadd.f32 %v200_v2, %v199_v1  ;;  %s208_s23 = scalar_lea.sflag [#allocation4], %s679_s30  ;;  %s466_s17 = scalar_lea.vmem %s225_s8, 32 }
  0x3e   : > { %p467_p1 = scmp.ne.s32.totalorder %s225_s8, %s466_s17  ;;  %s554_s24 = smov [#allocation7]  }
  0x3f   : > { %206 = vst.msk [vmem:[%s198_s21] sm:$0x3] %vm204_vm0, %v201_v3  ;;  %s470_s18 = sshll.u32 %s554_s24, 4  ;;  %s471_s18 = int_to_ptr.vmem [resolvable:$false] %s470_s18 }
  0x40   : > { %p468_p8 = pnand %p467_p1, %p656_p0  ;;  %s472_s12 = scalar_lea.vmem %s471_s18, 64 }
  0x41   : > { %p473_p11 = scmp.lt.s32.totalorder %s225_s8, %s471_s18  ;;  %p474_p2 = scmp.lt.s32.totalorder %s472_s12, %s466_s17 }
  0x42   : > { %p469_p13 = pneg %p468_p8 }
  0x43   : > { %p475_p12 = por %p474_p2, %p473_p11 }
  0x45   : > { %p476_p3 = pnand %p475_p12, %p469_p13 }
  0x47   : > { %479 = shalt.err (!%p476_p3)
}
  0x48   : > { %s480_s27 = scalar_lea.hbm %s222_s22, 32  ;;  %s484_s29 = scalar_lea.hbm %s733_s2, 64 }
  0x49   : > { %p481_p5 = scmp.ne.s32.totalorder %s222_s22, %s480_s27  ;;  %p485_p4 = scmp.lt.s32.totalorder %s222_s22, %s733_s2 }
  0x4a   : > { %p486_p10 = scmp.lt.s32.totalorder %s484_s29, %s480_s27 }
  0x4b   : > { %p482_p7 = pnand %p481_p5, %p656_p0 }
  0x4c   : > { %p487_p9 = por %p486_p10, %p485_p4 }
  0x4d   : > { %p483_p6 = pneg %p482_p7 }
  0x4f   : > { %p488_p1 = pnand %p487_p9, %p483_p6 }
  0x51   : > { %491 = shalt.err (!%p488_p1)
}
  0x52   : > { %345 = dma.vmem_to_hbm [thread:$0]  (%p656_p0), %s225_s8, 32, %s222_s22, %s208_s23  }
  0x53 PF: > { %s236_s6 = sand.u32 1, %s530_s9   ;;  %p744_p8 = scmp.ne.s32.totalorder %s738_s20, 0 }
  0x54   : > { %p745_p13 = scmp.ge.s32.totalorder %s550_s14, 2  ;;  %s237_s7 = scalar_lea.sflag [#allocation4], %s236_s6 }
  0x56   : > { %p356_p11 = pnand %p745_p13, %p744_p8 }
  0x58   : > { %p357_p2 = pneg %p356_p11 }
  0x5a   : > { %525 = dma.done.wait (%p357_p2), %s237_s7, 32  }
  0x5b   : > { %527 = vsyncadd (%p357_p2), %s237_s7, 4294967264  ;;  %s19_s14 = sadd.s32 1, %s550_s14   ;;  %s746_s9 = smov %s534_s10 }
  0x5c   : > { %p16_p12 = scmp.ge.s32.totalorder %s19_s14, 4   ;;  %s747_s10 = smov %s538_s11 }
  0x5d   : > { %s748_s11 = smov %s662_s5  ;;  %s749_s12 = smov %s546_s13 }
  0x5e   : > { %s750_s13 = smov %s752_s25  ;;  %18 = sbr.rel (!%p16_p12) target bundleno = 7 (0x7), region = 78 }
  0x63   :  { %242 = vsyncpa [#allocation3], 1 }
  0x64   :  { %244 = vsyncpa [#allocation3 + $0x1], 1 }
  0x65   :  { %245 = vsyncpa [#allocation6], 1 }
  0x66   :  { %246 = vsyncpa [#allocation4], 1 }
  0x67   :  { %248 = vsyncpa [#allocation4 + $0x1], 1 }

// kernel: tpu_custom_call.1
= control target key start
LH: loop header
LB: loop body
LE: loop exit
PB: predicated region body
PF: predicated region fallthrough
CT: control target
= control target key end

     0   :  { %7 = vsyncpa [#allocation3], 0  ;;  %s731_s0 = inlined_call_operand.hbm [shape: f32[2,1,256], index: 0, kind: input, shape index: {}]   ;;  %s732_s1 = inlined_call_operand.hbm [shape: f32[1,256], index: 1, kind: input, shape index: {}]   ;;  %s733_s2 = inlined_call_operand.hbm [shape: f32[2,1,256], index: 2, kind: output, shape index: {}]  }
   0x1   :  { %9 = vsyncpa [#allocation3 + $0x1], 0 }
   0x2   :  { %10 = vsyncpa [#allocation6], 0 }
   0x3   :  { %11 = vsyncpa [#allocation4], 0 }
   0x4   :  { %13 = vsyncpa [#allocation4 + $0x1], 0  ;;  %s570_s9 = smov 0   ;;  %s572_s10 = smov 0  }
   0x5   :  { %s574_s11 = smov 0   ;;  %s576_s12 = smov 0  }
   0x6   :  { %s578_s13 = smov 0   ;;  %s580_s14 = smov 0  }
   0x7 LB: > { %s320_s15 = sadd.s32 4294967295, %s550_s14   ;;  %s321_s16 = sadd.s32 4294967294, %s550_s14   ;;  %s550_s14 = sphi %s580_s14, %s19_s14   ;;  %s546_s13 = sphi %s578_s13, %s750_s13   ;;  %s542_s12 = sphi %s576_s12, %s749_s12   ;;  %s538_s11 = sphi %s574_s11, %s748_s11   ;;  %s534_s10 = sphi %s572_s10, %s747_s10   ;;  %s530_s9 = sphi %s570_s9, %s746_s9  }
   0x8   : > { %p53_p0 = scmp.ne.s32.totalorder %s534_s10, %s530_s9  ;;  %p604_p1 = scmp.eq.s32.totalorder %s320_s15, 0 }
   0x9   : > { %p608_p2 = scmp.eq.s32.totalorder %s320_s15, 1  ;;  %p111_p3 = scmp.eq.s32.totalorder %s321_s16, 1 }
   0xa   : > { %p614_p4 = por %p604_p1, %p53_p0  ;;  %p322_p5 = scmp.ge.s32.totalorder %s550_s14, 1 }
   0xb   : > { %p619_p6 = por %p111_p3, %p53_p0  ;;  %p118_p7 = scmp.lt.s32.totalorder %s550_s14, 3 }
   0xc   : > { %s737_s19 = scalar_select %p614_p4, 1, 0 }
   0xd   : > { %s738_s20 = scalar_select %p619_p6, 1, 0 }
   0xe   : > { %p624_p8 = pnand %p322_p5, %p118_p7  ;;  %s552_s22 = smov [#allocation5]  }
   0xf   : > { %s134_s23 = sshll.u32 %s552_s22, 4  ;;  %s28_s25 = sadd.s32 1, %s546_s13  ;;  %s135_s23 = int_to_ptr.vmem [resolvable:$true] %s134_s23 }
  0x10   : > { %p347_p10 = pneg %p624_p8  ;;  %s40_s26 = sadd.s32 1, %s538_s11 }
  0x11   : > { %p29_p12 = scmp.ge.s32.totalorder %s28_s25, 2  ;;  %s423_s27 = scalar_lea.vmem %s135_s23, 32 }
  0x12   : > { %p633_p11 = pnand %p347_p10, %p604_p1  ;;  %p424_p0 = scmp.ne.s32.totalorder %s135_s23, %s423_s27 }
  0x13   : > { %p431_p7 = scmp.lt.s32.totalorder %s135_s23, %s135_s23  ;;  %p432_p6 = scmp.lt.s32.totalorder %s423_s27, %s423_s27 }
  0x14   : > { %p414_p13 = pneg %p633_p11 }
  0x15   : > { %p433_p9 = por %p432_p6, %p431_p7 }
  0x16   : > { %p426_p3 = pnand %p424_p0, %p414_p13 }
  0x18   : > { %p427_p5 = pneg %p426_p3 }
  0x1a   : > { %p434_p4 = pnand %p433_p9, %p427_p5 }
  0x1c   : > { %437 = shalt.err (!%p434_p4)
}
  0x1d   : > { %350 = dma.hbm_to_vmem [thread:$0]  (!%p633_p11), %s732_s1, 32, %s135_s23, [#allocation6]  }
  0x1e   : > { %s752_s25 = smov (%p29_p12, %s28_s25), 0  ;;  %p47_p6 = scmp.ne.s32.totalorder %s538_s11, %s534_s10 }
  0x1f   : > { %p48_p4 = scmp.eq.s32.totalorder %s550_s14, 0  ;;  %s35_s30 = ssub.s32 %s546_s13, %s752_s25 }
  0x20   : > { %p360_p9 = scmp.lt.s32.totalorder %s550_s14, 2  ;;  %p38_p10 = scmp.eq.s32.totalorder %s35_s30, 0 }
  0x21   : > { %p49_p13 = por %p48_p4, %p47_p6  ;;  %p656_p0 = por %p608_p2, %p47_p6 }
  0x22   : > { %s145_s4 = sand.u32 1, %s538_s11   ;;  %s337_s7 = sshll.u32 %s546_s13, 5 }
  0x23   : > { %s662_s5 = scalar_select %p38_p10, %s538_s11, %s40_s26  }
  0x24   : > { %s325_s6 = sshll.u32 %s145_s4, 1  ;;  %s157_s16 = scalar_lea.hbm %s731_s0, %s337_s7 }
  0x25   : > { %s149_s22 = scalar_lea.vmem [#allocation2], %s325_s6  ;;  %p668_p11 = pnand %p360_p9, %p49_p13 }
  0x26   : > { %s159_s23 = sshll.u32 %s149_s22, 4  ;;  %s146_s18 = scalar_lea.sflag [#allocation3], %s145_s4  ;;  %s160_s23 = int_to_ptr.vmem [resolvable:$true] %s159_s23 }
  0x27   : > { %p440_p2 = pneg %p668_p11  ;;  %s451_s27 = scalar_lea.vmem %s160_s23, 32 }
  0x28   : > { %p452_p12 = scmp.ne.s32.totalorder %s160_s23, %s451_s27  ;;  %s553_s26 = smov [#allocation2]  }
  0x29   : > { %s456_s28 = sshll.u32 %s553_s26, 4  ;;  %s457_s28 = int_to_ptr.vmem [resolvable:$false] %s456_s28 }
  0x2a   : > { %p454_p3 = pnand %p452_p12, %p440_p2  ;;  %s458_s29 = scalar_lea.vmem %s457_s28, 64 }
  0x2b   : > { %p459_p7 = scmp.lt.s32.totalorder %s160_s23, %s457_s28  ;;  %p460_p6 = scmp.lt.s32.totalorder %s458_s29, %s451_s27 }
  0x2c   : > { %p455_p5 = pneg %p454_p3 }
  0x2d   : > { %p461_p4 = por %p460_p6, %p459_p7 }
  0x2f   : > { %p462_p10 = pnand %p461_p4, %p455_p5 }
  0x31   : > { %465 = shalt.err (!%p462_p10)
}
  0x32   : > { %354 = dma.hbm_to_vmem [thread:$0]  (!%p668_p11), %s157_s16, 32, %s160_s23, %s146_s18  }
  0x33   : > { %168 = sbr.rel (%p624_p8) target bundleno = 83 (0x53), region = 28  ;;  %s679_s30 = sand.u32 (!%p624_p8), 1, %s534_s10  }
  0x34   : > { %s329_s4 = sshll.u32 (!%p624_p8), %s679_s30, 1  ;;  %s171_s6 = scalar_lea.sflag (!%p624_p8), [#allocation3], %s679_s30 }
  0x35   : > { %s174_s7 = scalar_lea.vmem (!%p624_p8), [#allocation2], %s329_s4  ;;  %p743_p9 = scmp.ne.s32.totalorder (!%p624_p8), %s737_s19, 0 }
  0x38   : > { %517 = dma.done.wait (%p743_p9), %s171_s6, 32  }
  0x39   : > { %519 = vsyncadd (%p743_p9), %s171_s6, 4294967264 }
  0x3a   : > { %521 = dma.done.wait (%p604_p1), [#allocation6], 32  }
  0x3b   : > { %523 = vsyncadd (%p604_p1), [#allocation6], 4294967264  ;;  %v202_v0 = vlaneseq  ;;  %s198_s21 = scalar_lea.vmem [#allocation7], %s329_s4  ;;  %s338_s15 = sshll.u32 %s542_s12, 5  ;;  %v199_v1 = vld [vmem:[%s174_s7] sm:$0x3] }
  0x3c   : > { %s224_s8 = sshll.u32 %s198_s21, 4  ;;  %v200_v2 = vld [vmem:[#allocation5] sm:$0x3]  ;;  %s222_s22 = scalar_lea.hbm %s733_s2, %s338_s15  ;;  %s225_s8 = int_to_ptr.vmem [resolvable:$true] %s224_s8 }
  0x3d   : > { %vm204_vm0 = vcmp.lt.s32.totalorder %v202_v0, 256  ;;  %v201_v3 = vadd.f32 %v200_v2, %v199_v1  ;;  %s208_s23 = scalar_lea.sflag [#allocation4], %s679_s30  ;;  %s466_s17 = scalar_lea.vmem %s225_s8, 32 }
  0x3e   : > { %p467_p1 = scmp.ne.s32.totalorder %s225_s8, %s466_s17  ;;  %s554_s24 = smov [#allocation7]  }
  0x3f   : > { %206 = vst.msk [vmem:[%s198_s21] sm:$0x3] %vm204_vm0, %v201_v3  ;;  %s470_s18 = sshll.u32 %s554_s24, 4  ;;  %s471_s18 = int_to_ptr.vmem [resolvable:$false] %s470_s18 }
  0x40   : > { %p468_p8 = pnand %p467_p1, %p656_p0  ;;  %s472_s12 = scalar_lea.vmem %s471_s18, 64 }
  0x41   : > { %p473_p11 = scmp.lt.s32.totalorder %s225_s8, %s471_s18  ;;  %p474_p2 = scmp.lt.s32.totalorder %s472_s12, %s466_s17 }
  0x42   : > { %p469_p13 = pneg %p468_p8 }
  0x43   : > { %p475_p12 = por %p474_p2, %p473_p11 }
  0x45   : > { %p476_p3 = pnand %p475_p12, %p469_p13 }
  0x47   : > { %479 = shalt.err (!%p476_p3)
}
  0x48   : > { %s480_s27 = scalar_lea.hbm %s222_s22, 32  ;;  %s484_s29 = scalar_lea.hbm %s733_s2, 64 }
  0x49   : > { %p481_p5 = scmp.ne.s32.totalorder %s222_s22, %s480_s27  ;;  %p485_p4 = scmp.lt.s32.totalorder %s222_s22, %s733_s2 }
  0x4a   : > { %p486_p10 = scmp.lt.s32.totalorder %s484_s29, %s480_s27 }
  0x4b   : > { %p482_p7 = pnand %p481_p5, %p656_p0 }
  0x4c   : > { %p487_p9 = por %p486_p10, %p485_p4 }
  0x4d   : > { %p483_p6 = pneg %p482_p7 }
  0x4f   : > { %p488_p1 = pnand %p487_p9, %p483_p6 }
  0x51   : > { %491 = shalt.err (!%p488_p1)
}
  0x52   : > { %345 = dma.vmem_to_hbm [thread:$0]  (%p656_p0), %s225_s8, 32, %s222_s22, %s208_s23  }
  0x53 PF: > { %s236_s6 = sand.u32 1, %s530_s9   ;;  %p744_p8 = scmp.ne.s32.totalorder %s738_s20, 0 }
  0x54   : > { %p745_p13 = scmp.ge.s32.totalorder %s550_s14, 2  ;;  %s237_s7 = scalar_lea.sflag [#allocation4], %s236_s6 }
  0x56   : > { %p356_p11 = pnand %p745_p13, %p744_p8 }
  0x58   : > { %p357_p2 = pneg %p356_p11 }
  0x5a   : > { %525 = dma.done.wait (%p357_p2), %s237_s7, 32  }
  0x5b   : > { %527 = vsyncadd (%p357_p2), %s237_s7, 4294967264  ;;  %s19_s14 = sadd.s32 1, %s550_s14   ;;  %s746_s9 = smov %s534_s10 }
  0x5c   : > { %p16_p12 = scmp.ge.s32.totalorder %s19_s14, 4   ;;  %s747_s10 = smov %s538_s11 }
  0x5d   : > { %s748_s11 = smov %s662_s5  ;;  %s749_s12 = smov %s546_s13 }
  0x5e   : > { %s750_s13 = smov %s752_s25  ;;  %18 = sbr.rel (!%p16_p12) target bundleno = 7 (0x7), region = 78 }
  0x63   :  { %242 = vsyncpa [#allocation3], 1 }
  0x64   :  { %244 = vsyncpa [#allocation3 + $0x1], 1 }
  0x65   :  { %245 = vsyncpa [#allocation6], 1 }
  0x66   :  { %246 = vsyncpa [#allocation4], 1 }
  0x67   :  { %248 = vsyncpa [#allocation4 + $0x1], 1 }

</bundles_post_ra>
